<compile_context>
chip_gen: v5e
topology: v5e:2x2
jax: 0.10.0
libtpu: 0.0.40
codegen_flags: <defaults>
</compile_context>

<pallas_src>
import functools

import jax
import jax.numpy as jnp
import numpy as np
from jax.experimental import pallas as pl
from jax.experimental.pallas import tpu as pltpu


ACTIVATION_FUNCTION_TYPES = ["relu", "tanh"]

LANE = 128
SUBLANE = 8


def _round_up(x, m):
    return ((x + m - 1) // m) * m


def _fused_dense_nn_kernel(x_ref, w_ref, b_ref, o_ref, feat_ref, *,
                           n_layers, inner_offsets, activation_type):
    """Whole DenseNN forward for one batch tile, entirely in VMEM.

    x_ref:    (TB, F_pad)        zero-padded input occupying feature segment 0
    w_ref:    (L, F_pad, O_pad)  pre-transposed, zero-padded, segment-mapped weights
    b_ref:    (L, 1, O_pad)      zero-padded biases
    o_ref:    (TB, O_pad)        final-layer output (lane-padded; sliced in wrapper)
    feat_ref: (TB, F_pad)        VMEM scratch holding the concatenated features
    """
    # Segment 0 of the concatenated-feature scratch is the (zero-padded) input;
    # all other segments start at zero (x_ref is zero there too).
    feat_ref[...] = x_ref[...]

    for i in range(n_layers):  # unrolled: n_layers is small and static
        feat = feat_ref[...]                                   # (TB, F_pad)
        # Full-width matmul: zero-padded weight rows exactly kill the not-yet-written
        # / padding feature columns, so this equals the "growing prefix" matmul.
        y = jnp.dot(feat, w_ref[i], preferred_element_type=jnp.float32) + b_ref[i]
        if i != n_layers - 1:
            if activation_type == "relu":
                h = jnp.maximum(y, 0.0)
            else:  # tanh -> EUP
                h = jnp.tanh(y)
            # Padded output columns of y are exactly 0 (zero weight cols + zero bias),
            # and act(0) == 0, so storing the whole 128-aligned, 128-wide slab is both
            # exact and an unmasked lane-dense store.
            off = inner_offsets[i]                             # static, multiple of 128
            feat_ref[:, off:off + h.shape[-1]] = h
        else:
            o_ref[...] = y                                     # lane-dense final store


def _dense_nn_forward(x_pad, w_stack, b_stack, *, n_layers, inner_offsets,
                      activation_type, batch_tile):
    """One fused pallas_call over a batch grid."""
    b_pad, f_pad = x_pad.shape
    n_l, _, o_pad = w_stack.shape
    grid = (b_pad // batch_tile,)

    kernel = functools.partial(
        _fused_dense_nn_kernel,
        n_layers=n_layers,
        inner_offsets=inner_offsets,
        activation_type=activation_type,
    )

    return pl.pallas_call(
        kernel,
        out_shape=jax.ShapeDtypeStruct((b_pad, o_pad), jnp.float32),
        grid_spec=pltpu.PrefetchScalarGridSpec(
            num_scalar_prefetch=0,
            grid=grid,
            in_specs=[
                # batch tile of the (pre-padded) input
                pl.BlockSpec((batch_tile, f_pad), lambda i: (i, 0)),
                # weights/biases: constant block index -> loaded once, resident in VMEM
                pl.BlockSpec((n_l, f_pad, o_pad), lambda i: (0, 0, 0)),
                pl.BlockSpec((n_l, 1, o_pad), lambda i: (0, 0, 0)),
            ],
            out_specs=pl.BlockSpec((batch_tile, o_pad), lambda i: (i, 0)),
            scratch_shapes=[pltpu.VMEM((batch_tile, f_pad), jnp.float32)],
        ),
        compiler_params=pltpu.CompilerParams(
            dimension_semantics=("parallel",),   # batch axis -> megacore / v7x 2-TC
        ),
    )(x_pad, w_stack, b_stack)


class DenseNNPallas:
    """JAX/Pallas re-implementation of the PyTorch DenseNN forward pass."""

    def __init__(self, d_layers, activation_type="relu", key=None):
        assert isinstance(d_layers, list) and len(d_layers) >= 2
        assert activation_type in ACTIVATION_FUNCTION_TYPES
        self.d_layers = d_layers
        self.n_layers = len(d_layers) - 1
        self.d_in = d_layers[0]
        self.d_out = d_layers[-1]
        self.activation_type = activation_type

        if key is None:
            key = jax.random.PRNGKey(0)

        # ---- raw parameters (PyTorch nn.Linear convention, stored pre-transposed) ----
        self.w_t = []      # list of (fan_in_i, d_out_i) = W_i.T
        self.biases = []   # list of (d_out_i,)
        for i in range(self.n_layers):
            fan_in = int(np.sum(d_layers[: i + 1]))   # dense connectivity
            fan_out = d_layers[i + 1]
            key, kw, kb = jax.random.split(key, 3)
            bound = 1.0 / np.sqrt(fan_in)             # mimics torch.nn.Linear default init
            w = jax.random.uniform(kw, (fan_out, fan_in), jnp.float32, -bound, bound)
            b = jax.random.uniform(kb, (fan_out,), jnp.float32, -bound, bound)
            self.w_t.append(jnp.asarray(w).T)         # pre-transpose once, host side
            self.biases.append(jnp.asarray(b))

        # ---- fused, lane-padded layout ----
        # Feature scratch segments: [x | h_1 | h_2 | ...], each padded to 128 lanes.
        self.x_seg_w = _round_up(self.d_in, LANE)
        self.o_pad = _round_up(max(d_layers[1:]), LANE)
        n_inner = self.n_layers - 1
        self.f_pad = self.x_seg_w + n_inner * self.o_pad
        # Column offset where inner layer i writes its activation (128-aligned).
        self.inner_offsets = tuple(self.x_seg_w + k * self.o_pad for k in range(n_inner))
        # Offset of each original feature chunk (x, h_1, h_2, ...) in the padded layout.
        chunk_offsets = [0] + [self.x_seg_w + k * self.o_pad for k in range(n_inner)]

        w_stack = np.zeros((self.n_layers, self.f_pad, self.o_pad), np.float32)
        b_stack = np.zeros((self.n_layers, 1, self.o_pad), np.float32)
        for i in range(self.n_layers):
            wt = np.asarray(self.w_t[i])              # (fan_in_i, d_out_i)
            d_out_i = self.d_layers[i + 1]
            row = 0
            for j in range(i + 1):                    # scatter chunk j's rows to its segment
                cw = self.d_layers[j]
                off = chunk_offsets[j]
                w_stack[i, off:off + cw, :d_out_i] = wt[row:row + cw, :]
                row += cw
            b_stack[i, 0, :d_out_i] = np.asarray(self.biases[i])
        self.w_stack = jnp.asarray(w_stack)
        self.b_stack = jnp.asarray(b_stack)

    def __call__(self, x):
        batch = x.shape[0]
        # Batch tiling: whole batch as one tile when small, else 256-row tiles
        # (keeps each tile's VMEM footprint well under the v7x 64 MiB budget).
        if batch <= 256:
            b_pad = _round_up(max(batch, SUBLANE), SUBLANE)
            batch_tile = b_pad
        else:
            batch_tile = 256
            b_pad = _round_up(batch, batch_tile)

        x_pad = jnp.zeros((b_pad, self.f_pad), jnp.float32)
        x_pad = x_pad.at[:batch, :self.d_in].set(x.astype(jnp.float32))

        out_pad = _dense_nn_forward(
            x_pad, self.w_stack, self.b_stack,
            n_layers=self.n_layers,
            inner_offsets=self.inner_offsets,
            activation_type=self.activation_type,
            batch_tile=batch_tile,
        )
        return out_pad[:batch, :self.d_out]


def _reference_forward(model, x):
    """Pure-JAX reference (original DenseNN semantics) for correctness check."""
    act = (lambda v: jnp.maximum(v, 0.0)) if model.activation_type == "relu" else jnp.tanh
    for i in range(model.n_layers):
        wt, b = model.w_t[i], model.biases[i]
        y = x @ wt + b
        if i != model.n_layers - 1:
            x = jnp.concatenate([x, act(y)], axis=1)
        else:
            x = y
    return x


if __name__ == "__main__":
    key = jax.random.PRNGKey(0)
    k_in, k_model = jax.random.split(key)

    # Small shapes consistent with the module: d_layers = [d_in, hidden..., d_out]
    d_layers = [4, 32, 32, 8]
    batch = 8

    model = DenseNNPallas(d_layers, activation_type="tanh", key=k_model)
    x = jax.random.normal(k_in, (batch, d_layers[0]), dtype=jnp.float32)

    out = jax.block_until_ready(model(x))

    ref = _reference_forward(model, x)
    np.testing.assert_allclose(np.asarray(out), np.asarray(ref), rtol=1e-5, atol=1e-5)
    assert out.shape == (batch, d_layers[-1])

    print("KERNEL_OK")
</pallas_src>

<mosaic_0001>
module attributes {stable_mosaic.version = 11 : i64} {
  func.func @_fused_dense_nn_kernel(%arg0: i32, %arg1: memref<8x384xf32, #tpu.memory_space<vmem>>, %arg2: memref<3x384x128xf32, #tpu.memory_space<vmem>>, %arg3: memref<3x1x128xf32, #tpu.memory_space<vmem>>, %arg4: memref<8x128xf32, #tpu.memory_space<vmem>>, %arg5: memref<8x384xf32, #tpu.memory_space<vmem>>) attributes {dimension_semantics = [#tpu.dimension_semantics<parallel>], iteration_bounds = array<i64: 1>, scalar_prefetch = 0 : i64, scratch_operands = 1 : i64, tpu.core_type = #tpu.core_type<tc>, window_params = [{transform_indices = @transform_0, window_bounds = array<i64: 8, 384>}, {pipeline_mode = #tpu.pipeline_mode<synchronous>, transform_indices = @transform_1, window_bounds = array<i64: 3, 384, 128>}, {pipeline_mode = #tpu.pipeline_mode<synchronous>, transform_indices = @transform_2, window_bounds = array<i64: 3, 1, 128>}, {transform_indices = @transform_3, window_bounds = array<i64: 8, 128>}]} {
    %c0 = arith.constant 0 : index
    %c0_0 = arith.constant 0 : index
    %0 = vector.load %arg1[%c0, %c0_0] : memref<8x384xf32, #tpu.memory_space<vmem>>, vector<8x384xf32>
    %c0_1 = arith.constant 0 : index
    %c0_2 = arith.constant 0 : index
    %1 = vector.load %arg5[%c0_1, %c0_2] : memref<8x384xf32, #tpu.memory_space<vmem>>, vector<8x384xf32>
    tpu.vector_store %arg5[%c0_1, %c0_2], %0 {strides = array<i32>} : memref<8x384xf32, #tpu.memory_space<vmem>>, vector<8x384xf32>,
    %c0_3 = arith.constant 0 : index
    %c0_4 = arith.constant 0 : index
    %2 = vector.load %arg5[%c0_3, %c0_4] : memref<8x384xf32, #tpu.memory_space<vmem>>, vector<8x384xf32>
    %c0_5 = arith.constant 0 : index
    %c0_6 = arith.constant 0 : index
    %c0_7 = arith.constant 0 : index
    %3 = vector.load %arg2[%c0_5, %c0_6, %c0_7] : memref<3x384x128xf32, #tpu.memory_space<vmem>>, vector<1x384x128xf32>
    %4 = vector.shape_cast %3 : vector<1x384x128xf32> to vector<384x128xf32>
    %cst = arith.constant dense<0.000000e+00> : vector<8x128xf32>
    %5 = tpu.matmul %2, %4, %cst {dimension_numbers = #tpu.dot_dimension_numbers<[1], [0], [0], [1], [0, 0, 1, 1], [], []>} : vector<8x384xf32>, vector<384x128xf32>, vector<8x128xf32> -> vector<8x128xf32>
    %c0_8 = arith.constant 0 : index
    %c0_9 = arith.constant 0 : index
    %c0_10 = arith.constant 0 : index
    %6 = vector.load %arg3[%c0_8, %c0_9, %c0_10] : memref<3x1x128xf32, #tpu.memory_space<vmem>>, vector<1x1x128xf32>
    %7 = vector.shape_cast %6 : vector<1x1x128xf32> to vector<1x128xf32>
    %8 = vector.broadcast %7 : vector<1x128xf32> to vector<8x128xf32>
    %9 = arith.addf %5, %8 : vector<8x128xf32>
    %10 = math.tanh %9 : vector<8x128xf32>
    %c0_11 = arith.constant 0 : index
    %c128 = arith.constant 128 : index
    %11 = vector.load %arg5[%c0_11, %c128] : memref<8x384xf32, #tpu.memory_space<vmem>>, vector<8x128xf32>
    tpu.vector_store %arg5[%c0_11, %c128], %10 {strides = array<i32>} : memref<8x384xf32, #tpu.memory_space<vmem>>, vector<8x128xf32>,
    %c0_12 = arith.constant 0 : index
    %c0_13 = arith.constant 0 : index
    %12 = vector.load %arg5[%c0_12, %c0_13] : memref<8x384xf32, #tpu.memory_space<vmem>>, vector<8x384xf32>
    %c1 = arith.constant 1 : index
    %c0_14 = arith.constant 0 : index
    %c0_15 = arith.constant 0 : index
    %13 = vector.load %arg2[%c1, %c0_14, %c0_15] : memref<3x384x128xf32, #tpu.memory_space<vmem>>, vector<1x384x128xf32>
    %14 = vector.shape_cast %13 : vector<1x384x128xf32> to vector<384x128xf32>
    %cst_16 = arith.constant dense<0.000000e+00> : vector<8x128xf32>
    %15 = tpu.matmul %12, %14, %cst_16 {dimension_numbers = #tpu.dot_dimension_numbers<[1], [0], [0], [1], [0, 0, 1, 1], [], []>} : vector<8x384xf32>, vector<384x128xf32>, vector<8x128xf32> -> vector<8x128xf32>
    %c1_17 = arith.constant 1 : index
    %c0_18 = arith.constant 0 : index
    %c0_19 = arith.constant 0 : index
    %16 = vector.load %arg3[%c1_17, %c0_18, %c0_19] : memref<3x1x128xf32, #tpu.memory_space<vmem>>, vector<1x1x128xf32>
    %17 = vector.shape_cast %16 : vector<1x1x128xf32> to vector<1x128xf32>
    %18 = vector.broadcast %17 : vector<1x128xf32> to vector<8x128xf32>
    %19 = arith.addf %15, %18 : vector<8x128xf32>
    %20 = math.tanh %19 : vector<8x128xf32>
    %c0_20 = arith.constant 0 : index
    %c256 = arith.constant 256 : index
    %21 = vector.load %arg5[%c0_20, %c256] : memref<8x384xf32, #tpu.memory_space<vmem>>, vector<8x128xf32>
    tpu.vector_store %arg5[%c0_20, %c256], %20 {strides = array<i32>} : memref<8x384xf32, #tpu.memory_space<vmem>>, vector<8x128xf32>,
    %c0_21 = arith.constant 0 : index
    %c0_22 = arith.constant 0 : index
    %22 = vector.load %arg5[%c0_21, %c0_22] : memref<8x384xf32, #tpu.memory_space<vmem>>, vector<8x384xf32>
    %c2 = arith.constant 2 : index
    %c0_23 = arith.constant 0 : index
    %c0_24 = arith.constant 0 : index
    %23 = vector.load %arg2[%c2, %c0_23, %c0_24] : memref<3x384x128xf32, #tpu.memory_space<vmem>>, vector<1x384x128xf32>
    %24 = vector.shape_cast %23 : vector<1x384x128xf32> to vector<384x128xf32>
    %cst_25 = arith.constant dense<0.000000e+00> : vector<8x128xf32>
    %25 = tpu.matmul %22, %24, %cst_25 {dimension_numbers = #tpu.dot_dimension_numbers<[1], [0], [0], [1], [0, 0, 1, 1], [], []>} : vector<8x384xf32>, vector<384x128xf32>, vector<8x128xf32> -> vector<8x128xf32>
    %c2_26 = arith.constant 2 : index
    %c0_27 = arith.constant 0 : index
    %c0_28 = arith.constant 0 : index
    %26 = vector.load %arg3[%c2_26, %c0_27, %c0_28] : memref<3x1x128xf32, #tpu.memory_space<vmem>>, vector<1x1x128xf32>
    %27 = vector.shape_cast %26 : vector<1x1x128xf32> to vector<1x128xf32>
    %28 = vector.broadcast %27 : vector<1x128xf32> to vector<8x128xf32>
    %29 = arith.addf %25, %28 : vector<8x128xf32>
    %c0_29 = arith.constant 0 : index
    %c0_30 = arith.constant 0 : index
    %30 = vector.load %arg4[%c0_29, %c0_30] : memref<8x128xf32, #tpu.memory_space<vmem>>, vector<8x128xf32>
    tpu.vector_store %arg4[%c0_29, %c0_30], %29 {strides = array<i32>} : memref<8x128xf32, #tpu.memory_space<vmem>>, vector<8x128xf32>,
    return
  }
  func.func @transform_0(%arg0: i32) -> (i32, i32) {
    %c0_i32 = arith.constant 0 : i32
    %c0_i32_0 = arith.constant 0 : i32
    return %arg0, %c0_i32 : i32, i32
  }
  func.func @transform_1(%arg0: i32) -> (i32, i32, i32) {
    %c0_i32 = arith.constant 0 : i32
    %c0_i32_0 = arith.constant 0 : i32
    %c0_i32_1 = arith.constant 0 : i32
    %c0_i32_2 = arith.constant 0 : i32
    return %c0_i32, %c0_i32_0, %c0_i32_1 : i32, i32, i32
  }
  func.func @transform_2(%arg0: i32) -> (i32, i32, i32) {
    %c0_i32 = arith.constant 0 : i32
    %c0_i32_0 = arith.constant 0 : i32
    %c0_i32_1 = arith.constant 0 : i32
    %c0_i32_2 = arith.constant 0 : i32
    return %c0_i32, %c0_i32_0, %c0_i32_1 : i32, i32, i32
  }
  func.func @transform_3(%arg0: i32) -> (i32, i32) {
    %c0_i32 = arith.constant 0 : i32
    %c0_i32_0 = arith.constant 0 : i32
    return %arg0, %c0_i32 : i32, i32
  }
}

</mosaic_0001>

<bundles_post_ra>
// kernel: tpu_custom_call.1
= control target key start
LH: loop header
LB: loop body
LE: loop exit
PB: predicated region body
PF: predicated region fallthrough
CT: control target
= control target key end

     0   :  { %8 = vsyncpa [#allocation4], 0  ;;  %s604_s0 = inlined_call_operand.hbm [shape: f32[8,384], index: 0, kind: input, shape index: {}]   ;;  %s605_s1 = inlined_call_operand.hbm [shape: f32[3,384,128], index: 1, kind: input, shape index: {}]   ;;  %s606_s2 = inlined_call_operand.hbm [shape: f32[3,1,128], index: 2, kind: input, shape index: {}]   ;;  %s607_s3 = inlined_call_operand.hbm [shape: f32[8,128], index: 3, kind: output, shape index: {}]  }
   0x1   :  { %9 = vsyncpa [#allocation7], 0  ;;  %s26_s14 = sshll.u32 %s605_s1, 4  ;;  %s27_s14 = int_to_ptr.hbm [resolvable:$true] %s26_s14 }
   0x2   :  { %10 = vsyncpa [#allocation5], 0  ;;  %s555_s15 = smov [#allocation6]   ;;  %s16_s19 = sshll.u32 %s604_s0, 4  ;;  %s17_s19 = int_to_ptr.hbm [resolvable:$true] %s16_s19 }
   0x3   :  { %s28_s16 = sshll.u32 %s555_s15, 4  ;;  %s556_s20 = smov 128   ;;  %s29_s16 = int_to_ptr.vmem [resolvable:$true] %s28_s16 }
   0x4   :  { %s557_s21 = smov 8   ;;  %s558_s22 = smov [#allocation3]  }
   0x5   :  { %34 = dma.hbm_to_vmem [thread:$0]  %s27_s14, 18432, %s29_s16, [#allocation7], %s556_s20, %s556_s20, %s557_s21  }
   0x6   :  { %s18_s23 = sshll.u32 %s558_s22, 4  ;;  %s39_s26 = sshll.u32 %s606_s2, 4  ;;  %s19_s23 = int_to_ptr.vmem [resolvable:$true] %s18_s23  ;;  %s40_s26 = int_to_ptr.hbm [resolvable:$true] %s39_s26 }
   0x7   :  { %21 = dma.hbm_to_vmem [thread:$0]  %s17_s19, 384, %s19_s23, [#allocation4]  }
   0x8   :  { %s559_s1 = smov [#allocation8]   ;;  %s560_s28 = smov 16  }
   0x9   :  { %s41_s27 = sshll.u32 %s559_s1, 4  ;;  %s561_s29 = smov 1   ;;  %s42_s27 = int_to_ptr.vmem [resolvable:$true] %s41_s27 }
   0xa   :  { %47 = dma.hbm_to_vmem [thread:$0]  %s40_s26, 48, %s42_s27, [#allocation7], %s560_s28, %s560_s28, %s561_s29  }
   0xb   :  { %549 = dma.done.wait [#allocation4], 384  }
   0xc   :  { %550 = vsyncadd [#allocation4], 4294966912 }
   0xd   :  { %551 = dma.done.wait [#allocation7], 18480  }
   0xe   :  { %552 = vsyncadd [#allocation7], 4294948816  ;;  %v116_v0 = vld [vmem:[#allocation6 + $0x178] sm:$0xff]  ;;  %v115_v2 = vld [vmem:[#allocation6 + $0x170] sm:$0xff]  ;;  %s562_s0 = smov [#allocation9]   ;;  %s427_s5 = sshll.u32 %s607_s3, 4  ;;  %s428_s5 = int_to_ptr.hbm [resolvable:$true] %s427_s5 }
   0xf   :  { %v84_v1 = vld [vmem:[#allocation6 + $0x78] sm:$0xff]  ;;  %161 = vmatpush.msra.mxu2 %v116_v0  ;;  %v83_v3 = vld [vmem:[#allocation6 + $0x70] sm:$0xff]  ;;  %v114_v5 = vld [vmem:[#allocation6 + $0x168] sm:$0xff]  ;;  %s425_s2 = sshll.u32 %s562_s0, 4  ;;  %s426_s2 = int_to_ptr.vmem [resolvable:$true] %s425_s2 }
  0x10   :  { %121 = vmatpush.msra.mxu0 %v84_v1  ;;  %v100_v4 = vld [vmem:[#allocation6 + $0xf8] sm:$0xff]  ;;  %v82_v6 = vld [vmem:[#allocation6 + $0x68] sm:$0xff]  ;;  %v99_v7 = vld [vmem:[#allocation6 + $0xf0] sm:$0xff] }
  0x11   :  { %141 = vmatpush.msra.mxu1 %v100_v4  ;;  %162 = vmatpush.msra.mxu2 %v115_v2  ;;  %v98_v8 = vld [vmem:[#allocation6 + $0xe8] sm:$0xff]  ;;  %v113_v9 = vld [vmem:[#allocation6 + $0x160] sm:$0xff]  ;;  %v112_v12 = vld [vmem:[#allocation6 + $0x158] sm:$0xff] }
  0x12   :  { %122 = vmatpush.msra.mxu0 %v83_v3  ;;  %v81_v10 = vld [vmem:[#allocation6 + $0x60] sm:$0xff]  ;;  %v80_v13 = vld [vmem:[#allocation6 + $0x58] sm:$0xff]  ;;  %v111_v15 = vld [vmem:[#allocation6 + $0x150] sm:$0xff] }
  0x13   :  { %142 = vmatpush.msra.mxu1 %v99_v7  ;;  %163 = vmatpush.msra.mxu2 %v114_v5  ;;  %v97_v11 = vld [vmem:[#allocation6 + $0xe0] sm:$0xff]  ;;  %v96_v14 = vld [vmem:[#allocation6 + $0xd8] sm:$0xff]  ;;  %v79_v16 = vld [vmem:[#allocation6 + $0x50] sm:$0xff] }
  0x14   :  { %123 = vmatpush.msra.mxu0 %v82_v6  ;;  %v95_v17 = vld [vmem:[#allocation6 + $0xd0] sm:$0xff]  ;;  %v110_v18 = vld [vmem:[#allocation6 + $0x148] sm:$0xff]  ;;  %v109_v21 = vld [vmem:[#allocation6 + $0x140] sm:$0xff] }
  0x15   :  { %143 = vmatpush.msra.mxu1 %v98_v8  ;;  %164 = vmatpush.msra.mxu2 %v113_v9  ;;  %v78_v19 = vld [vmem:[#allocation6 + $0x48] sm:$0xff]  ;;  %v77_v22 = vld [vmem:[#allocation6 + $0x40] sm:$0xff]  ;;  %v108_v24 = vld [vmem:[#allocation6 + $0x138] sm:$0xff] }
  0x16   :  { %124 = vmatpush.msra.mxu0 %v81_v10  ;;  %v94_v20 = vld [vmem:[#allocation6 + $0xc8] sm:$0xff]  ;;  %v93_v23 = vld [vmem:[#allocation6 + $0xc0] sm:$0xff]  ;;  %v76_v25 = vld [vmem:[#allocation6 + $0x38] sm:$0xff] }
  0x17   :  { %144 = vmatpush.msra.mxu1 %v97_v11  ;;  %165 = vmatpush.msra.mxu2 %v112_v12  ;;  %v92_v26 = vld [vmem:[#allocation6 + $0xb8] sm:$0xff]  ;;  %v107_v27 = vld [vmem:[#allocation6 + $0x130] sm:$0xff]  ;;  %v106_v32 = vld [vmem:[#allocation6 + $0x128] sm:$0xff] }
  0x18   :  { %125 = vmatpush.msra.mxu0 %v80_v13  ;;  %v75_v28 = vld [vmem:[#allocation6 + $0x30] sm:$0xff]  ;;  %v202_v30 = vld [vmem:[#allocation6 + $0x1f8] sm:$0xff]  ;;  %v74_v33 = vld [vmem:[#allocation6 + $0x28] sm:$0xff] }
  0x19   :  { %145 = vmatpush.msra.mxu1 %v96_v14  ;;  %166 = vmatpush.msra.mxu2 %v111_v15  ;;  %v91_v29 = vld [vmem:[#allocation6 + $0xb0] sm:$0xff]  ;;  %v90_v34 = vld [vmem:[#allocation6 + $0xa8] sm:$0xff]  ;;  %v105_v36 = vld [vmem:[#allocation6 + $0x120] sm:$0xff] }
  0x1a   :  { %126 = vmatpush.msra.mxu0 %v79_v16  ;;  %v201_v31 = vld [vmem:[#allocation6 + $0x1f0] sm:$0xff]  ;;  %240 = vmatpush.msra.mxu3 %v202_v30  ;;  %v200_v35 = vld [vmem:[#allocation6 + $0x1e8] sm:$0xff]  ;;  %v73_v37 = vld [vmem:[#allocation6 + $0x20] sm:$0xff] }
  0x1b   :  { %146 = vmatpush.msra.mxu1 %v95_v17  ;;  %167 = vmatpush.msra.mxu2 %v110_v18  ;;  %v89_v38 = vld [vmem:[#allocation6 + $0xa0] sm:$0xff]  ;;  %v104_v40 = vld [vmem:[#allocation6 + $0x118] sm:$0xff]  ;;  %v103_v44 = vld [vmem:[#allocation6 + $0x110] sm:$0xff] }
  0x1c   :  { %127 = vmatpush.msra.mxu0 %v78_v19  ;;  %241 = vmatpush.msra.mxu3 %v201_v31  ;;  %v199_v39 = vld [vmem:[#allocation6 + $0x1e0] sm:$0xff]  ;;  %v72_v41 = vld [vmem:[#allocation6 + $0x18] sm:$0xff]  ;;  %v71_v45 = vld [vmem:[#allocation6 + $0x10] sm:$0xff] }
  0x1d   :  { %147 = vmatpush.msra.mxu1 %v94_v20  ;;  %168 = vmatpush.msra.mxu2 %v109_v21  ;;  %v88_v42 = vld [vmem:[#allocation6 + $0x98] sm:$0xff]  ;;  %v87_v46 = vld [vmem:[#allocation6 + $0x90] sm:$0xff]  ;;  %v102_v48 = vld [vmem:[#allocation6 + $0x108] sm:$0xff] }
  0x1e   :  { %128 = vmatpush.msra.mxu0 %v77_v22  ;;  %242 = vmatpush.msra.mxu3 %v200_v35  ;;  %v198_v43 = vld [vmem:[#allocation6 + $0x1d8] sm:$0xff]  ;;  %v197_v47 = vld [vmem:[#allocation6 + $0x1d0] sm:$0xff]  ;;  %v70_v49 = vld [vmem:[#allocation6 + $0x8] sm:$0xff] }
  0x1f   :  { %148 = vmatpush.msra.mxu1 %v93_v23  ;;  %169 = vmatpush.msra.mxu2 %v108_v24  ;;  %v86_v50 = vld [vmem:[#allocation6 + $0x88] sm:$0xff]  ;;  %v101_v52 = vld [vmem:[#allocation6 + $0x100] sm:$0xff]  ;;  %v592_v54 = vld [vmem:[#allocation3 + $0x10] sm:$0xff] }
  0x20   :  { %129 = vmatpush.msra.mxu0 %v76_v25  ;;  %243 = vmatpush.msra.mxu3 %v199_v39  ;;  %v196_v51 = vld [vmem:[#allocation6 + $0x1c8] sm:$0xff]  ;;  %v69_v53 = vld [vmem:[#allocation6] sm:$0xff]  ;;  %v61_v58 = vld [vmem:[#allocation3 + $0x8] sm:$0xff] }
  0x21   :  { %149 = vmatpush.msra.mxu1 %v92_v26  ;;  %170 = vmatpush.msra.mxu2 %v107_v27  ;;  %v594_v55 = vld [vmem:[#allocation3] sm:$0xff]  ;;  %v85_v56 = vld [vmem:[#allocation6 + $0x80] sm:$0xff]  ;;  %v321_v59 = vld [vmem:[#allocation6 + $0x378] sm:$0xff] }
  0x22   :  { %130 = vmatpush.msra.mxu0 %v75_v28  ;;  %244 = vmatpush.msra.mxu3 %v198_v43  ;;  %v195_v57 = vld [vmem:[#allocation6 + $0x1c0] sm:$0xff]  ;;  %v194_v60 = vld [vmem:[#allocation6 + $0x1b8] sm:$0xff]  ;;  %v193_v62 = vld [vmem:[#allocation6 + $0x1b0] sm:$0xff] }
  0x23   :  { %150 = vmatpush.msra.mxu1 %v91_v29  ;;  %171 = vmatpush.msra.mxu2 %v106_v32  ;;  %v218_v61 = vld [vmem:[#allocation6 + $0x278] sm:$0xff]  ;;  %v320_v63 = vld [vmem:[#allocation6 + $0x370] sm:$0xff]  ;;  %v319_v2 = vld [vmem:[#allocation6 + $0x368] sm:$0xff] }
  0x24   :  { %131 = vmatpush.msra.mxu0 %v74_v33  ;;  %245 = vmatpush.msra.mxu3 %v197_v47  ;;  %v234_v0 = vld [vmem:[#allocation6 + $0x2f8] sm:$0xff]  ;;  %v217_v1 = vld [vmem:[#allocation6 + $0x270] sm:$0xff]  ;;  %v192_v4 = vld [vmem:[#allocation6 + $0x1a8] sm:$0xff] }
  0x25   :  { %151 = vmatpush.msra.mxu1 %v90_v34  ;;  %172 = vmatpush.msra.mxu2 %v105_v36  ;;  %v233_v3 = vld [vmem:[#allocation6 + $0x2f0] sm:$0xff]  ;;  %v216_v5 = vld [vmem:[#allocation6 + $0x268] sm:$0xff]  ;;  %v318_v6 = vld [vmem:[#allocation6 + $0x360] sm:$0xff] }
  0x26   :  { %132 = vmatpush.msra.mxu0 %v73_v37  ;;  %246 = vmatpush.msra.mxu3 %v196_v51  ;;  %v232_v7 = vld [vmem:[#allocation6 + $0x2e8] sm:$0xff]  ;;  %v191_v8 = vld [vmem:[#allocation6 + $0x1a0] sm:$0xff]  ;;  %v317_v10 = vld [vmem:[#allocation6 + $0x358] sm:$0xff] }
  0x27   :  { %152 = vmatpush.msra.mxu1 %v89_v38  ;;  %173 = vmatpush.msra.mxu2 %v104_v40  ;;  %v215_v9 = vld [vmem:[#allocation6 + $0x260] sm:$0xff]  ;;  %v190_v12 = vld [vmem:[#allocation6 + $0x198] sm:$0xff]  ;;  %v316_v14 = vld [vmem:[#allocation6 + $0x350] sm:$0xff] }
  0x28   :  { %133 = vmatpush.msra.mxu0 %v72_v41  ;;  %247 = vmatpush.msra.mxu3 %v195_v57  ;;  %v231_v11 = vld [vmem:[#allocation6 + $0x2e0] sm:$0xff]  ;;  %v214_v13 = vld [vmem:[#allocation6 + $0x258] sm:$0xff]  ;;  %v189_v16 = vld [vmem:[#allocation6 + $0x190] sm:$0xff] }
  0x29   :  { %153 = vmatpush.msra.mxu1 %v88_v42  ;;  %174 = vmatpush.msra.mxu2 %v103_v44  ;;  %v230_v15 = vld [vmem:[#allocation6 + $0x2d8] sm:$0xff]  ;;  %v213_v17 = vld [vmem:[#allocation6 + $0x250] sm:$0xff]  ;;  %v315_v18 = vld [vmem:[#allocation6 + $0x348] sm:$0xff] }
  0x2a   :  { %134 = vmatpush.msra.mxu0 %v71_v45  ;;  %248 = vmatpush.msra.mxu3 %v194_v60  ;;  %v229_v19 = vld [vmem:[#allocation6 + $0x2d0] sm:$0xff]  ;;  %v188_v20 = vld [vmem:[#allocation6 + $0x188] sm:$0xff]  ;;  %v314_v22 = vld [vmem:[#allocation6 + $0x340] sm:$0xff] }
  0x2b   :  { %154 = vmatpush.msra.mxu1 %v87_v46  ;;  %175 = vmatpush.msra.mxu2 %v102_v48  ;;  %v212_v21 = vld [vmem:[#allocation6 + $0x248] sm:$0xff]  ;;  %v187_v24 = vld [vmem:[#allocation6 + $0x180] sm:$0xff]  ;;  %v337_v26 = vld [vmem:[#allocation6 + $0x3f8] sm:$0xff] }
  0x2c   :  { %135 = vmatpush.msra.mxu0 %v70_v49  ;;  %249 = vmatpush.msra.mxu3 %v193_v62  ;;  %v228_v23 = vld [vmem:[#allocation6 + $0x2c8] sm:$0xff]  ;;  %v211_v25 = vld [vmem:[#allocation6 + $0x240] sm:$0xff]  ;;  %v313_v27 = vld [vmem:[#allocation6 + $0x338] sm:$0xff] }
  0x2d   :  { %155 = vmatpush.msra.mxu1 %v86_v50  ;;  %176 = vmatpush.msra.mxu2 %v101_v52  ;;  %v210_v28 = vld [vmem:[#allocation6 + $0x238] sm:$0xff]  ;;  %v227_v29 = vld [vmem:[#allocation6 + $0x2c0] sm:$0xff]  ;;  %v336_v30 = vld [vmem:[#allocation6 + $0x3f0] sm:$0xff] }
  0x2e   :  { %136 = vmatpush.msra.mxu0 %v69_v53  ;;  %177 = vmatmul.f32.vlgmr.msra.gmra.mxu2 %v592_v54  ;;  %v312_v31 = vld [vmem:[#allocation6 + $0x330] sm:$0xff]  ;;  %v335_v32 = vld [vmem:[#allocation6 + $0x3e8] sm:$0xff]  ;;  %v334_v33 = vld [vmem:[#allocation6 + $0x3e0] sm:$0xff] }
  0x2f   :  { %137 = vmatmul.f32.vlgmr.msra.gmra.mxu0 %v594_v55  ;;  %156 = vmatpush.msra.mxu1 %v85_v56  ;;  %v333_v34 = vld [vmem:[#allocation6 + $0x3d8] sm:$0xff]  ;;  %v332_v35 = vld [vmem:[#allocation6 + $0x3d0] sm:$0xff]  ;;  %v331_v36 = vld [vmem:[#allocation6 + $0x3c8] sm:$0xff] }
  0x30   :  { %157 = vmatmul.f32.vlgmr.msra.gmra.mxu1 %v61_v58  ;;  %359 = vmatpush.msrb.mxu2 %v321_v59  ;;  %v330_v37 = vld [vmem:[#allocation6 + $0x3c0] sm:$0xff]  ;;  %v329_v38 = vld [vmem:[#allocation6 + $0x3b8] sm:$0xff]  ;;  %v209_v39 = vld [vmem:[#allocation6 + $0x230] sm:$0xff] }
  0x31   :  { %260 = vmatpush.msrb.mxu0 %v218_v61  ;;  %280 = vmatpush.msrb.mxu1 %v234_v0  ;;  %v226_v40 = vld [vmem:[#allocation6 + $0x2b8] sm:$0xff]  ;;  %v311_v41 = vld [vmem:[#allocation6 + $0x328] sm:$0xff]  ;;  %v328_v42 = vld [vmem:[#allocation6 + $0x3b0] sm:$0xff] }
  0x32   :  { %360 = vmatpush.msrb.mxu2 %v320_v63  ;;  %250 = vmatpush.msra.mxu3 %v192_v4  ;;  %v208_v43 = vld [vmem:[#allocation6 + $0x228] sm:$0xff]  ;;  %v225_v44 = vld [vmem:[#allocation6 + $0x2b0] sm:$0xff]  ;;  %v310_v45 = vld [vmem:[#allocation6 + $0x320] sm:$0xff] }
  0x33   :  { %261 = vmatpush.msrb.mxu0 %v217_v1  ;;  %281 = vmatpush.msrb.mxu1 %v233_v3  ;;  %v327_v46 = vld [vmem:[#allocation6 + $0x3a8] sm:$0xff]  ;;  %v207_v47 = vld [vmem:[#allocation6 + $0x220] sm:$0xff]  ;;  %v309_v49 = vld [vmem:[#allocation6 + $0x318] sm:$0xff] }
  0x34   :  { %361 = vmatpush.msrb.mxu2 %v319_v2  ;;  %251 = vmatpush.msra.mxu3 %v191_v8  ;;  %v224_v48 = vld [vmem:[#allocation6 + $0x2a8] sm:$0xff]  ;;  %v326_v50 = vld [vmem:[#allocation6 + $0x3a0] sm:$0xff]  ;;  %v206_v51 = vld [vmem:[#allocation6 + $0x218] sm:$0xff] }
  0x35   :  { %262 = vmatpush.msrb.mxu0 %v216_v5  ;;  %282 = vmatpush.msrb.mxu1 %v232_v7  ;;  %v223_v52 = vld [vmem:[#allocation6 + $0x2a0] sm:$0xff]  ;;  %v308_v53 = vld [vmem:[#allocation6 + $0x310] sm:$0xff]  ;;  %v325_v56 = vld [vmem:[#allocation6 + $0x398] sm:$0xff] }
  0x36   :  { %362 = vmatpush.msrb.mxu2 %v318_v6  ;;  %252 = vmatpush.msra.mxu3 %v190_v12  ;;  %v205_v57 = vld [vmem:[#allocation6 + $0x210] sm:$0xff]  ;;  %v222_v58 = vld [vmem:[#allocation6 + $0x298] sm:$0xff]  ;;  %v307_v59 = vld [vmem:[#allocation6 + $0x308] sm:$0xff] }
  0x37   :  { %263 = vmatpush.msrb.mxu0 %v215_v9  ;;  %283 = vmatpush.msrb.mxu1 %v231_v11  ;;  %v324_v60 = vld [vmem:[#allocation6 + $0x390] sm:$0xff]  ;;  %v204_v61 = vld [vmem:[#allocation6 + $0x208] sm:$0xff]  ;;  %v306_v63 = vld [vmem:[#allocation6 + $0x300] sm:$0xff] }
  0x38   :  { %363 = vmatpush.msrb.mxu2 %v317_v10  ;;  %253 = vmatpush.msra.mxu3 %v189_v16  ;;  %v221_v62 = vld [vmem:[#allocation6 + $0x290] sm:$0xff]  ;;  %v323_v0 = vld [vmem:[#allocation6 + $0x388] sm:$0xff]  ;;  %v203_v1 = vld [vmem:[#allocation6 + $0x200] sm:$0xff] }
  0x39   :  { %264 = vmatpush.msrb.mxu0 %v214_v13  ;;  %284 = vmatpush.msrb.mxu1 %v230_v15  ;;  %v220_v2 = vld [vmem:[#allocation6 + $0x288] sm:$0xff]  ;;  %v322_v3 = vld [vmem:[#allocation6 + $0x380] sm:$0xff]  ;;  %v353_v5 = vld [vmem:[#allocation6 + $0x478] sm:$0xff] }
  0x3a   :  { %364 = vmatpush.msrb.mxu2 %v316_v14  ;;  %254 = vmatpush.msra.mxu3 %v188_v20  ;;  %v219_v4 = vld [vmem:[#allocation6 + $0x280] sm:$0xff]  ;;  %v352_v6 = vld [vmem:[#allocation6 + $0x470] sm:$0xff]  ;;  %v351_v7 = vld [vmem:[#allocation6 + $0x468] sm:$0xff] }
  0x3b   :  { %265 = vmatpush.msrb.mxu0 %v213_v17  ;;  %285 = vmatpush.msrb.mxu1 %v229_v19  ;;  %v350_v8 = vld [vmem:[#allocation6 + $0x460] sm:$0xff]  ;;  %v349_v9 = vld [vmem:[#allocation6 + $0x458] sm:$0xff]  ;;  %v348_v10 = vld [vmem:[#allocation6 + $0x450] sm:$0xff] }
  0x3c   :  { %365 = vmatpush.msrb.mxu2 %v315_v18  ;;  %255 = vmatpush.msra.mxu3 %v187_v24  ;;  %v347_v11 = vld [vmem:[#allocation6 + $0x448] sm:$0xff]  ;;  %v446_v12 = vld [vmem:[#allocation8] ss:$0 sm:$0xff]  ;;  %v345_v13 = vld [vmem:[#allocation6 + $0x438] sm:$0xff] }
  0x3d   :  { %266 = vmatpush.msrb.mxu0 %v212_v21  ;;  %286 = vmatpush.msrb.mxu1 %v228_v23  ;;  %v344_v15 = vld [vmem:[#allocation6 + $0x430] sm:$0xff]  ;;  %v343_v21 = vld [vmem:[#allocation6 + $0x428] sm:$0xff]  ;;  %v341_v23 = vld [vmem:[#allocation6 + $0x418] sm:$0xff] }
  0x3e   :  { %366 = vmatpush.msrb.mxu2 %v314_v22  ;;  %379 = vmatpush.msrb.mxu3 %v337_v26  ;;  %v342_v22 = vld [vmem:[#allocation6 + $0x420] sm:$0xff]  ;;  %v340_v24 = vld [vmem:[#allocation6 + $0x410] sm:$0xff] }
  0x3f   :  { %267 = vmatpush.msrb.mxu0 %v211_v25  ;;  %287 = vmatpush.msrb.mxu1 %v227_v29  ;;  %v339_v25 = vld [vmem:[#allocation6 + $0x408] sm:$0xff]  ;;  %v338_v26 = vld [vmem:[#allocation6 + $0x400] sm:$0xff] }
  0x40   :  { %367 = vmatpush.msrb.mxu2 %v313_v27  ;;  %380 = vmatpush.msrb.mxu3 %v336_v30  ;;  %v447_v27 = vld [vmem:[#allocation8 + $0x1] ss:$0 sm:$0xff] }
  0x41   :  { %268 = vmatpush.msrb.mxu0 %v210_v28  ;;  %256 = vmatmul.f32.vlgmr.msra.gmra.mxu3 %v594_v55 }
  0x42   :  { %368 = vmatpush.msrb.mxu2 %v312_v31  ;;  %381 = vmatpush.msrb.mxu3 %v335_v32 }
  0x43   :  { %269 = vmatpush.msrb.mxu0 %v209_v39  ;;  %288 = vmatpush.msrb.mxu1 %v226_v40 }
  0x44   :  { %382 = vmatpush.msrb.mxu3 %v334_v33  ;;  %369 = vmatpush.msrb.mxu2 %v311_v41 }
  0x45   :  { %270 = vmatpush.msrb.mxu0 %v208_v43  ;;  %289 = vmatpush.msrb.mxu1 %v225_v44 }
  0x46   :  { %383 = vmatpush.msrb.mxu3 %v333_v34  ;;  %370 = vmatpush.msrb.mxu2 %v310_v45 }
  0x47   :  { %271 = vmatpush.msrb.mxu0 %v207_v47  ;;  %290 = vmatpush.msrb.mxu1 %v224_v48 }
  0x48   :  { %384 = vmatpush.msrb.mxu3 %v332_v35  ;;  %371 = vmatpush.msrb.mxu2 %v309_v49  ;;  %v448_v35 = vld [vmem:[#allocation8 + $0x2] ss:$0 sm:$0xff] }
  0x49   :  { %272 = vmatpush.msrb.mxu0 %v206_v51  ;;  %291 = vmatpush.msrb.mxu1 %v223_v52 }
  0x4a   :  { %385 = vmatpush.msrb.mxu3 %v331_v36  ;;  %372 = vmatpush.msrb.mxu2 %v308_v53 }
  0x4b   :  { %273 = vmatpush.msrb.mxu0 %v205_v57  ;;  %292 = vmatpush.msrb.mxu1 %v222_v58 }
  0x4c   :  { %386 = vmatpush.msrb.mxu3 %v330_v37  ;;  %373 = vmatpush.msrb.mxu2 %v307_v59 }
  0x4d   :  { %274 = vmatpush.msrb.mxu0 %v204_v61  ;;  %293 = vmatpush.msrb.mxu1 %v221_v62 }
  0x4e   :  { %387 = vmatpush.msrb.mxu3 %v329_v38  ;;  %374 = vmatpush.msrb.mxu2 %v306_v63 }
  0x4f   :  { %375 = vmatmul.f32.vlgmr.msrb.gmra.mxu2 %v594_v55  ;;  %275 = vmatpush.msrb.mxu0 %v203_v1  ;;  %v346_v55 = vld [vmem:[#allocation6 + $0x440] sm:$0xff] }
  0x50   :  { %388 = vmatpush.msrb.mxu3 %v328_v42  ;;  %294 = vmatpush.msrb.mxu1 %v220_v2 }
  0x51   :  { %399 = vmatpush.msra.mxu0 %v353_v5 }
  0x52   :  { %389 = vmatpush.msrb.mxu3 %v327_v46  ;;  %295 = vmatpush.msrb.mxu1 %v219_v4 }
  0x53   :  { %296 = vmatmul.f32.vlgmr.msrb.gmra.mxu1 %v592_v54  ;;  %400 = vmatpush.msra.mxu0 %v352_v6 }
  0x54   :  { %390 = vmatpush.msrb.mxu3 %v326_v50 }
  0x55   :  { %401 = vmatpush.msra.mxu0 %v351_v7 }
  0x56   :  { %391 = vmatpush.msrb.mxu3 %v325_v56 }
  0x57   :  { %402 = vmatpush.msra.mxu0 %v350_v8 }
  0x58   :  { %392 = vmatpush.msrb.mxu3 %v324_v60 }
  0x59   :  { %403 = vmatpush.msra.mxu0 %v349_v9 }
  0x5a   :  { %393 = vmatpush.msrb.mxu3 %v323_v0 }
  0x5b   :  { %404 = vmatpush.msra.mxu0 %v348_v10 }
  0x5c   :  { %394 = vmatpush.msrb.mxu3 %v322_v3 }
  0x5d   :  { %405 = vmatpush.msra.mxu0 %v347_v11 }
  0x5f   :  { %406 = vmatpush.msra.mxu0 %v346_v55 }
  0x61   :  { %407 = vmatpush.msra.mxu0 %v345_v13 }
  0x63   :  { %408 = vmatpush.msra.mxu0 %v344_v15 }
  0x65   :  { %409 = vmatpush.msra.mxu0 %v343_v21 }
  0x67   :  { %410 = vmatpush.msra.mxu0 %v342_v22 }
  0x69   :  { %411 = vmatpush.msra.mxu0 %v341_v23 }
  0x6b   :  { %412 = vmatpush.msra.mxu0 %v340_v24 }
  0x6d   :  { %413 = vmatpush.msra.mxu0 %v339_v25 }
  0x6f   :  { %414 = vmatpush.msra.mxu0 %v338_v26 }
  0xac   :  { %v138_v14 = vpop.f32.mrf.mxu0 }
  0xad   :  { %v139_v16 = vadd.f32 %v446_v12, %v138_v14  ;;  %v158_v17 = vpop.f32.mrf.mxu1 }
  0xaf   :  { %v159_v54 = vadd.f32 %v158_v17, %v139_v16 }
  0xb1   :  { %v178_v18 = vpop.f32.mrf.mxu2 }
  0xb2   :  { %v179_v19 = vadd.f32 %v178_v18, %v159_v54 }
  0xb4   :  { %449 = vtanh.f32 %v179_v19 }
  0xba   :  { %v450_v20 = vpop.eup %449 }
  0xbb   :  { %276 = vmatmul.f32.vlgmr.msrb.gmra.mxu0 %v450_v20  ;;  %395 = vmatmul.f32.vlgmr.msrb.gmra.mxu3 %v450_v20 }
  0xc4   :  { %v257_v28 = vpop.f32.mrf.mxu3 }
  0xc5   :  { %v258_v29 = vadd.f32 %v447_v27, %v257_v28 }
  0xd0   :  { %v297_v31 = vpop.f32.mrf.mxu1 }
  0xd2   :  { %v376_v36 = vpop.f32.mrf.mxu2 }
  0xd3   :  { %v377_v37 = vadd.f32 %v448_v35, %v376_v36 }
 0x138   :  { %v277_v30 = vpop.f32.mrf.mxu0 }
 0x139   :  { %v278_v32 = vadd.f32 %v277_v30, %v258_v29 }
 0x13b   :  { %v298_v33 = vadd.f32 %v297_v31, %v278_v32 }
 0x13d   :  { %451 = vtanh.f32 %v298_v33 }
 0x13e   :  { %v396_v38 = vpop.f32.mrf.mxu3 }
 0x13f   :  { %v397_v39 = vadd.f32 %v396_v38, %v377_v37 }
 0x143   :  { %v452_v34 = vpop.eup %451 }
 0x144   :  { %415 = vmatmul.f32.vlgmr.msra.gmra.mxu0 %v452_v34 }
 0x1c1   :  { %v416_v40 = vpop.f32.mrf.mxu0 }
 0x1c2   :  { %v417_v41 = vadd.f32 %v416_v40, %v397_v39 }
 0x1c4   :  { %419 = vst [vmem:[#allocation9] sm:$0xff] %v417_v41 }
 0x1c5   :  { %430 = dma.vmem_to_hbm [thread:$0]  %s426_s2, 128, %s428_s5, [#allocation5]  }
 0x1c6   :  { %553 = dma.done.wait [#allocation5], 128  }
 0x1c7   :  { %554 = vsyncadd [#allocation5], 4294967168 }
 0x1c8   :  { %435 = vsyncpa [#allocation4], 1 }
 0x1c9   :  { %436 = vsyncpa [#allocation7], 1 }
 0x1ca   :  { %437 = vsyncpa [#allocation5], 1 }

</bundles_post_ra>
